<compile_context>
chip_gen: v7x
topology: tpu7x:2x2x1
jax: 0.10.0
libtpu: 0.0.40
codegen_flags: <defaults>
</compile_context>

<pallas_src>
import jax
import jax.numpy as jnp
from jax.experimental import pallas as pl
from jax.experimental.pallas import tpu as pltpu

_LANE = 1024        # lane-dense last dim (multiple of 128)
_TILE_ROWS = 512    # 512 x 1024 f32 = 2 MiB per tile; safe on all generations


def _identity_kernel(x_ref, o_ref):
    # Straight VMEM tile copy; data movement is done by the BlockSpec DMA
    # pipeline (double-buffered, overlapped with this store).
    o_ref[...] = x_ref[...]


def identity_forward(x: jax.Array, use_kernel: bool = True) -> jax.Array:
    """Pallas implementation of IdentityModule.forward: returns x unchanged.

    use_kernel=False returns x directly (the genuinely optimal identity —
    zero HBM traffic). use_kernel=True materializes the result through a
    tiled, lane-dense Pallas copy kernel.
    """
    if not use_kernel or x.size == 0:
        return x

    orig_shape = x.shape
    orig_dtype = x.dtype
    n = x.size

    # Flatten fully and lay out as (rows, 1024) so every vreg store and DMA
    # row is lane-dense (full 128-lane width, 512 B rows for f32).
    flat = x.reshape(-1)
    rows = -(-n // _LANE)  # ceil

    # Pick a block row-count: either the full row extent (always legal as a
    # full-extent block) or a fixed 512-row tile (multiple of 8 sublanes).
    if rows <= _TILE_ROWS:
        block_rows = rows
        rows_pad = rows
    else:
        block_rows = _TILE_ROWS
        rows_pad = -(-rows // _TILE_ROWS) * _TILE_ROWS

    n_full = rows_pad * _LANE
    if n_full != n:
        # Pad the tail so the 2-D view is exact; sliced off after the kernel.
        flat = jnp.pad(flat, (0, n_full - n))

    x2d = flat.reshape(rows_pad, _LANE)
    grid = (rows_pad // block_rows,)

    out2d = pl.pallas_call(
        _identity_kernel,
        out_shape=jax.ShapeDtypeStruct((rows_pad, _LANE), orig_dtype),
        grid=grid,
        in_specs=[pl.BlockSpec((block_rows, _LANE), lambda i: (i, 0))],
        out_specs=pl.BlockSpec((block_rows, _LANE), lambda i: (i, 0)),
        compiler_params=pltpu.CompilerParams(
            dimension_semantics=("parallel",),
        ),
    )(x2d)

    out_flat = out2d.reshape(-1)
    if n_full != n:
        out_flat = out_flat[:n]
    return out_flat.reshape(orig_shape)


class IdentityModuleJax:
    """JAX/Pallas equivalent of the PyTorch IdentityModule."""

    def __init__(self, output_length: int = 1):
        # output_length is unused in forward (matches the PyTorch module).
        self.output_length = output_length

    def __call__(self, x: jax.Array, use_kernel: bool = True) -> jax.Array:
        return identity_forward(x, use_kernel=use_kernel)


if __name__ == "__main__":
    key = jax.random.PRNGKey(0)
    # Small NCHW example consistent with a typical conv-style input.
    x = jax.random.normal(key, (2, 4, 16, 16), dtype=jnp.float32)

    model = IdentityModuleJax(output_length=1)
    y = model(x)                      # runs the Pallas copy kernel once
    y = jax.block_until_ready(y)

    assert y.shape == x.shape and y.dtype == x.dtype
    assert bool(jnp.all(y == x))

    # Zero-cost path (no kernel launch) also matches.
    y_fast = jax.block_until_ready(model(x, use_kernel=False))
    assert bool(jnp.all(y_fast == x))

    print("KERNEL_OK")
</pallas_src>

<mosaic_0001>
module attributes {stable_mosaic.version = 11 : i64} {
  func.func @_identity_kernel(%arg0: i32, %arg1: memref<2x1024xf32, #tpu.memory_space<vmem>>, %arg2: memref<2x1024xf32, #tpu.memory_space<vmem>>) attributes {dimension_semantics = [#tpu.dimension_semantics<parallel>], iteration_bounds = array<i64: 1>, scalar_prefetch = 0 : i64, scratch_operands = 0 : i64, tpu.core_type = #tpu.core_type<tc>, window_params = [{transform_indices = @transform_0, window_bounds = array<i64: 2, 1024>}, {transform_indices = @transform_1, window_bounds = array<i64: 2, 1024>}]} {
    %c0 = arith.constant 0 : index
    %c0_0 = arith.constant 0 : index
    %0 = vector.load %arg1[%c0, %c0_0] : memref<2x1024xf32, #tpu.memory_space<vmem>>, vector<2x1024xf32>
    %c0_1 = arith.constant 0 : index
    %c0_2 = arith.constant 0 : index
    %1 = vector.load %arg2[%c0_1, %c0_2] : memref<2x1024xf32, #tpu.memory_space<vmem>>, vector<2x1024xf32>
    tpu.vector_store %arg2[%c0_1, %c0_2], %0 {strides = array<i32>} : memref<2x1024xf32, #tpu.memory_space<vmem>>, vector<2x1024xf32>,
    return
  }
  func.func @transform_0(%arg0: i32) -> (i32, i32) {
    %c0_i32 = arith.constant 0 : i32
    %c0_i32_0 = arith.constant 0 : i32
    return %arg0, %c0_i32 : i32, i32
  }
  func.func @transform_1(%arg0: i32) -> (i32, i32) {
    %c0_i32 = arith.constant 0 : i32
    %c0_i32_0 = arith.constant 0 : i32
    return %arg0, %c0_i32 : i32, i32
  }
}

</mosaic_0001>

<bundles_post_ra>
// kernel: tpu_custom_call.1
= control target key start
LH: loop header
LB: loop body
LE: loop exit
PB: predicated region body
PF: predicated region fallthrough
CT: control target
= control target key end

     0   :  { %6 = vsyncpa [#allocation3], 0  ;;  %s126_s0 = inlined_call_operand.hbm [shape: f32[2,1024], index: 0, kind: input, shape index: {}]   ;;  %s127_s1 = inlined_call_operand.hbm [shape: f32[2,1024], index: 1, kind: output, shape index: {}]  }
   0x1   :  { %7 = vsyncpa [#allocation4], 0  ;;  %s90_s6 = smov [#allocation2]   ;;  %s42_s10 = scalar_lea.hbm %s126_s0, 256 }
   0x2   :  { %s14_s7 = sshll.u32 %s90_s6, 4  ;;  %p43_p0 = scmp.ne.s32.totalorder %s126_s0, %s42_s10  ;;  %s15_s7 = int_to_ptr.vmem [resolvable:$true] %s14_s7 }
   0x3   :  { %p46_p1 = scmp.lt.u32.totalorder %s42_s10, %s126_s0 }
   0x5   :  { %p48_p2 = pnand %p46_p1, %p43_p0 }
   0x7   :  { %51 = shalt.err (!%p48_p2)
}
   0x8   :  { %s52_s15 = scalar_lea.vmem %s15_s7, 256  ;;  %p57_p4 = scmp.lt.s32.totalorder %s15_s7, %s15_s7 }
   0x9   :  { %p53_p3 = scmp.ne.s32.totalorder %s15_s7, %s52_s15  ;;  %p58_p5 = scmp.lt.s32.totalorder %s52_s15, %s52_s15 }
   0xb   :  { %p59_p6 = por %p58_p5, %p57_p4 }
   0xd   :  { %p60_p7 = pnand %p59_p6, %p53_p3 }
   0xf   :  { %63 = shalt.err (!%p60_p7)
}
  0x10   :  { %17 = dma.hbm_to_vmem [thread:$0]  %s126_s0, 256, %s15_s7, [#allocation3]  }
  0x11   :  { %86 = dma.done.wait [#allocation3], 256  }
  0x12   :  { %87 = vsyncadd [#allocation3], 4294967040  ;;  %s91_s18 = smov [#allocation5]   ;;  %v21_v0 = vld [vmem:[#allocation2] sm:$0xff]  ;;  %v22_v1 = vld [vmem:[#allocation2 + $0x8] sm:$0xff] }
  0x13   :  { %s31_s19 = sshll.u32 %s91_s18, 4  ;;  %23 = vst [vmem:[#allocation5] sm:$0xff] %v21_v0  ;;  %24 = vst [vmem:[#allocation5 + $0x8] sm:$0xff] %v22_v1  ;;  %s32_s19 = int_to_ptr.vmem [resolvable:$true] %s31_s19 }
  0x14   :  { %s64_s20 = scalar_lea.vmem %s32_s19, 256  ;;  %p69_p9 = scmp.lt.s32.totalorder %s32_s19, %s32_s19 }
  0x15   :  { %p65_p8 = scmp.ne.s32.totalorder %s32_s19, %s64_s20  ;;  %p70_p10 = scmp.lt.s32.totalorder %s64_s20, %s64_s20 }
  0x17   :  { %p71_p11 = por %p70_p10, %p69_p9 }
  0x19   :  { %p72_p12 = pnand %p71_p11, %p65_p8 }
  0x1b   :  { %75 = shalt.err (!%p72_p12)
}
  0x1c   :  { %s76_s0 = scalar_lea.hbm %s127_s1, 256 }
  0x1d   :  { %p77_p13 = scmp.ne.s32.totalorder %s127_s1, %s76_s0  ;;  %p80_p0 = scmp.lt.u32.totalorder %s76_s0, %s127_s1 }
  0x1f   :  { %p82_p1 = pnand %p80_p0, %p77_p13 }
  0x21   :  { %85 = shalt.err (!%p82_p1)
}
  0x22   :  { %34 = dma.vmem_to_hbm [thread:$0]  %s32_s19, 256, %s127_s1, [#allocation4]  }
  0x23   :  { %88 = dma.done.wait [#allocation4], 256  }
  0x24   :  { %89 = vsyncadd [#allocation4], 4294967040 }
  0x25   :  { %38 = vsyncpa [#allocation3], 1 }
  0x26   :  { %39 = vsyncpa [#allocation4], 1 }

</bundles_post_ra>
